<compile_context>
chip_gen: v7x
topology: tpu7x:2x2x1
jax: 0.10.0
libtpu: 0.0.40
codegen_flags: <defaults>
</compile_context>

<pallas_src>
import jax
import jax.numpy as jnp
from jax.experimental import pallas as pl
from jax.experimental.pallas import tpu as pltpu


def _round_up(x, m):
    return ((x + m - 1) // m) * m


def _vmem_capacity_bytes():
    """Physical VMEM of the local chip; conservative fallback if unavailable."""
    try:
        cap = getattr(pltpu.get_tpu_info(), "vmem_capacity_bytes", None)
        if cap:
            return int(cap)
    except Exception:
        pass
    return 64 * 1024 * 1024  # v7x-sized conservative default


def _make_mlp_kernel(n_mid, has_hidden):
    """Kernel for: first layer [+ n_mid middle hidden layers + out layer]."""

    def kernel(*refs):
        it = iter(refs)
        x_ref, w1_ref, b1_ref = next(it), next(it), next(it)
        if n_mid > 0:
            wm_ref, bm_ref = next(it), next(it)
        if has_hidden:
            wo_ref, bo_ref = next(it), next(it)
        o_ref = next(it)

        # First layer: K = H (unpadded x); bf16 operands, f32 accumulation.
        h = jnp.dot(x_ref[...].astype(jnp.bfloat16), w1_ref[...],
                    preferred_element_type=jnp.float32) + b1_ref[...]
        if has_hidden:
            h = jnp.maximum(h, 0.0)                                      # ReLU
            for l in range(n_mid):                                       # static unroll
                h = jnp.dot(h.astype(jnp.bfloat16), wm_ref[l],
                            preferred_element_type=jnp.float32) + bm_ref[l]
                h = jnp.maximum(h, 0.0)
            # TODO(synk): dropout is eval-mode identity (no RNG mask / 1/(1-p) scale).
            h = jnp.dot(h.astype(jnp.bfloat16), wo_ref[...],
                        preferred_element_type=jnp.float32) + bo_ref[...]
        o_ref[...] = h.astype(o_ref.dtype)

    return kernel


def _choose_tm(M, per_row_bytes, weight_bytes, vmem_budget, row_align):
    """Row tile: row_align multiple, VMEM-bounded, >= 4 grid steps when possible."""
    avail = vmem_budget - 2 * weight_bytes           # weight slab is double-buffered
    avail = max(avail, per_row_bytes * row_align)    # always allow the minimum tile
    tm_cap = (avail // per_row_bytes) // row_align * row_align
    tm_cap = max(row_align, min(1024, tm_cap))       # big tiles help v5e HBM roofline
    tm = min(tm_cap, _round_up(M, row_align))
    # Prefer >= 4 grid steps (pipelining + both v7x TensorCores busy) while keeping
    # at least row_align rows per tile; ~0.35 us per-step overhead stays negligible.
    while M > row_align and tm > row_align and pl.cdiv(_round_up(M, row_align), tm) < 4:
        tm = max(row_align, (tm // 2) // row_align * row_align)
    return tm


def mlp_forward(params, x):
    """x: (batch, seq, hidden) -> (batch, seq, output_dim). Single fused kernel."""
    B, S, H = x.shape
    w_out, b_out = params["out"]
    O = w_out.shape[1]
    L = len(params["lins"])
    has_hidden = L >= 1
    n_mid = max(L - 1, 0)

    P_h = _round_up(H, 128)      # lane-dense hidden width
    P_out = _round_up(O, 128)    # lane-dense (narrow) output width
    M = B * S

    # ---- pack weights (bf16) / biases (f32); zero padding keeps the math exact.
    if has_hidden:
        w0, b0 = params["lins"][0]
        P1 = P_h
    else:                         # n_layer == 0: the "first" layer is `out` itself
        w0, b0 = w_out, b_out
        P1 = P_out
    w_first = jnp.pad(w0, ((0, 0), (0, P1 - w0.shape[1]))).astype(jnp.bfloat16)
    b_first = jnp.pad(b0, (0, P1 - b0.shape[0])).astype(jnp.float32).reshape(1, P1)

    operands = [w_first, b_first]
    w_specs = [
        pl.BlockSpec((H, P1), lambda i: (0, 0)),       # resident: constant index map
        pl.BlockSpec((1, P1), lambda i: (0, 0)),
    ]
    if n_mid > 0:
        wm = jnp.stack([jnp.pad(w, ((0, P_h - H), (0, P_h - H)))
                        for (w, _) in params["lins"][1:]]).astype(jnp.bfloat16)
        bm = jnp.stack([jnp.pad(b, (0, P_h - H))
                        for (_, b) in params["lins"][1:]]
                       ).astype(jnp.float32).reshape(n_mid, 1, P_h)
        operands += [wm, bm]
        w_specs += [
            pl.BlockSpec((n_mid, P_h, P_h), lambda i: (0, 0, 0)),
            pl.BlockSpec((n_mid, 1, P_h), lambda i: (0, 0, 0)),
        ]
    if has_hidden:
        wo = jnp.pad(w_out, ((0, P_h - H), (0, P_out - O))).astype(jnp.bfloat16)
        bo = jnp.pad(b_out, (0, P_out - O)).astype(jnp.float32).reshape(1, P_out)
        operands += [wo, bo]
        w_specs += [
            pl.BlockSpec((P_h, P_out), lambda i: (0, 0)),
            pl.BlockSpec((1, P_out), lambda i: (0, 0)),
        ]
    weight_bytes = sum(int(op.size) * op.dtype.itemsize for op in operands)

    # ---- tile sizing from the actual chip's VMEM.
    x_bytes = jnp.dtype(x.dtype).itemsize
    row_align = 16 if x_bytes < 4 else 8             # bf16 sublane packing
    vmem_limit = min(int(_vmem_capacity_bytes() * 0.75), 100 * 1024 * 1024)
    vmem_budget = int(vmem_limit * 0.8)              # headroom for compiler scratch
    P_max = max(P_h, P_out)
    per_row_bytes = (2 * H * x_bytes                 # double-buffered x tile
                     + 2 * P_out * x_bytes           # double-buffered out tile
                     + 3 * P_max * 4)                # live f32 intermediates in the body
    tm = _choose_tm(M, per_row_bytes, weight_bytes, vmem_budget, row_align)
    M_pad = _round_up(M, tm)

    # Only row padding; the feature dim stays at H (no wrapper lane-pad pass).
    x2 = x.reshape(M, H)
    if M_pad > M:
        x2 = jnp.pad(x2, ((0, M_pad - M), (0, 0)))

    y_pad = pl.pallas_call(
        _make_mlp_kernel(n_mid, has_hidden),
        out_shape=jax.ShapeDtypeStruct((M_pad, P_out), x.dtype),
        grid_spec=pltpu.PrefetchScalarGridSpec(
            num_scalar_prefetch=0,
            grid=(M_pad // tm,),
            in_specs=[pl.BlockSpec((tm, H), lambda i: (i, 0))] + w_specs,
            out_specs=pl.BlockSpec((tm, P_out), lambda i: (i, 0)),
        ),
        compiler_params=pltpu.CompilerParams(
            dimension_semantics=("parallel",),
            vmem_limit_bytes=vmem_limit),
    )(x2, *operands)

    return y_pad[:M, :O].reshape(B, S, O)


def init_mlp_params(key, n_layer, hidden_dim, output_dim, dtype=jnp.float32):
    """Deterministic synthetic parameters (shapes match nn.Linear layers)."""
    params = {"lins": [], "out": None}
    keys = jax.random.split(key, n_layer + 1)
    for l in range(n_layer):
        kw, kb = jax.random.split(keys[l])
        # stored as (in_dim, out_dim) == transpose of PyTorch's (out, in)
        w = jax.random.normal(kw, (hidden_dim, hidden_dim), dtype) * 0.05
        b = jax.random.normal(kb, (hidden_dim,), dtype) * 0.05
        params["lins"].append((w, b))
    kw, kb = jax.random.split(keys[-1])
    w_out = jax.random.normal(kw, (hidden_dim, output_dim), dtype) * 0.05
    b_out = jax.random.normal(kb, (output_dim,), dtype) * 0.05
    params["out"] = (w_out, b_out)
    return params


def mlp_reference(params, x):
    """Pure-JAX f32 reference for correctness check."""
    h = x
    for (w, b) in params["lins"]:
        h = jax.nn.relu(jnp.einsum("bsh,ho->bso", h, w) + b)
    w_out, b_out = params["out"]
    return jnp.einsum("bsh,ho->bso", h, w_out) + b_out


if __name__ == "__main__":
    key = jax.random.PRNGKey(0)
    k_params, k_x = jax.random.split(key)

    n_layer, hidden_dim, output_dim, dpo = 2, 32, 8, 0.2
    batch, seq = 2, 8

    params = init_mlp_params(k_params, n_layer, hidden_dim, output_dim)
    x = jax.random.normal(k_x, (batch, seq, hidden_dim), jnp.float32)

    y = mlp_forward(params, x)
    y = jax.block_until_ready(y)

    y_ref = mlp_reference(params, x)
    assert y.shape == (batch, seq, output_dim)
    # Tolerance loosened for bf16 matmul operands (f32 accumulation kept).
    assert jnp.allclose(y, y_ref, atol=2e-2, rtol=2e-2), "mismatch vs reference"

    print("KERNEL_OK")
</pallas_src>

<mosaic_0001>
module attributes {stable_mosaic.version = 11 : i64} {
  func.func @kernel(%arg0: i32, %arg1: memref<8x32xf32, #tpu.memory_space<vmem>>, %arg2: memref<32x128xbf16, #tpu.memory_space<vmem>>, %arg3: memref<1x128xf32, #tpu.memory_space<vmem>>, %arg4: memref<1x128x128xbf16, #tpu.memory_space<vmem>>, %arg5: memref<1x1x128xf32, #tpu.memory_space<vmem>>, %arg6: memref<128x128xbf16, #tpu.memory_space<vmem>>, %arg7: memref<1x128xf32, #tpu.memory_space<vmem>>, %arg8: memref<8x128xf32, #tpu.memory_space<vmem>>) attributes {dimension_semantics = [#tpu.dimension_semantics<parallel>], iteration_bounds = array<i64: 2>, scalar_prefetch = 0 : i64, scratch_operands = 0 : i64, tpu.core_type = #tpu.core_type<tc>, window_params = [{transform_indices = @transform_0, window_bounds = array<i64: 8, 32>}, {pipeline_mode = #tpu.pipeline_mode<synchronous>, transform_indices = @transform_1, window_bounds = array<i64: 32, 128>}, {pipeline_mode = #tpu.pipeline_mode<synchronous>, transform_indices = @transform_2, window_bounds = array<i64: 1, 128>}, {pipeline_mode = #tpu.pipeline_mode<synchronous>, transform_indices = @transform_3, window_bounds = array<i64: 1, 128, 128>}, {pipeline_mode = #tpu.pipeline_mode<synchronous>, transform_indices = @transform_4, window_bounds = array<i64: 1, 1, 128>}, {pipeline_mode = #tpu.pipeline_mode<synchronous>, transform_indices = @transform_5, window_bounds = array<i64: 128, 128>}, {pipeline_mode = #tpu.pipeline_mode<synchronous>, transform_indices = @transform_6, window_bounds = array<i64: 1, 128>}, {transform_indices = @transform_7, window_bounds = array<i64: 8, 128>}]} {
    %c0 = arith.constant 0 : index
    %c0_0 = arith.constant 0 : index
    %0 = vector.load %arg1[%c0, %c0_0] : memref<8x32xf32, #tpu.memory_space<vmem>>, vector<8x32xf32>
    %1 = arith.truncf %0 : vector<8x32xf32> to vector<8x32xbf16>
    %c0_1 = arith.constant 0 : index
    %c0_2 = arith.constant 0 : index
    %2 = vector.load %arg2[%c0_1, %c0_2] : memref<32x128xbf16, #tpu.memory_space<vmem>>, vector<32x128xbf16>
    %cst = arith.constant dense<0.000000e+00> : vector<8x128xf32>
    %3 = tpu.matmul %1, %2, %cst {dimension_numbers = #tpu.dot_dimension_numbers<[1], [0], [0], [1], [0, 0, 1, 1], [], []>} : vector<8x32xbf16>, vector<32x128xbf16>, vector<8x128xf32> -> vector<8x128xf32>
    %c0_3 = arith.constant 0 : index
    %c0_4 = arith.constant 0 : index
    %4 = vector.load %arg3[%c0_3, %c0_4] : memref<1x128xf32, #tpu.memory_space<vmem>>, vector<1x128xf32>
    %5 = vector.broadcast %4 : vector<1x128xf32> to vector<8x128xf32>
    %6 = arith.addf %3, %5 : vector<8x128xf32>
    %cst_5 = arith.constant 0.000000e+00 : f32
    %7 = vector.broadcast %cst_5 : f32 to vector<8x128xf32>
    %8 = arith.maximumf %6, %7 : vector<8x128xf32>
    %9 = arith.truncf %8 : vector<8x128xf32> to vector<8x128xbf16>
    %c0_6 = arith.constant 0 : index
    %c0_7 = arith.constant 0 : index
    %c0_8 = arith.constant 0 : index
    %10 = vector.load %arg4[%c0_6, %c0_7, %c0_8] : memref<1x128x128xbf16, #tpu.memory_space<vmem>>, vector<1x128x128xbf16>
    %11 = vector.shape_cast %10 : vector<1x128x128xbf16> to vector<128x128xbf16>
    %cst_9 = arith.constant dense<0.000000e+00> : vector<8x128xf32>
    %12 = tpu.matmul %9, %11, %cst_9 {dimension_numbers = #tpu.dot_dimension_numbers<[1], [0], [0], [1], [0, 0, 1, 1], [], []>} : vector<8x128xbf16>, vector<128x128xbf16>, vector<8x128xf32> -> vector<8x128xf32>
    %c0_10 = arith.constant 0 : index
    %c0_11 = arith.constant 0 : index
    %c0_12 = arith.constant 0 : index
    %13 = vector.load %arg5[%c0_10, %c0_11, %c0_12] : memref<1x1x128xf32, #tpu.memory_space<vmem>>, vector<1x1x128xf32>
    %14 = vector.shape_cast %13 : vector<1x1x128xf32> to vector<1x128xf32>
    %15 = vector.broadcast %14 : vector<1x128xf32> to vector<8x128xf32>
    %16 = arith.addf %12, %15 : vector<8x128xf32>
    %cst_13 = arith.constant 0.000000e+00 : f32
    %17 = vector.broadcast %cst_13 : f32 to vector<8x128xf32>
    %18 = arith.maximumf %16, %17 : vector<8x128xf32>
    %19 = arith.truncf %18 : vector<8x128xf32> to vector<8x128xbf16>
    %c0_14 = arith.constant 0 : index
    %c0_15 = arith.constant 0 : index
    %20 = vector.load %arg6[%c0_14, %c0_15] : memref<128x128xbf16, #tpu.memory_space<vmem>>, vector<128x128xbf16>
    %cst_16 = arith.constant dense<0.000000e+00> : vector<8x128xf32>
    %21 = tpu.matmul %19, %20, %cst_16 {dimension_numbers = #tpu.dot_dimension_numbers<[1], [0], [0], [1], [0, 0, 1, 1], [], []>} : vector<8x128xbf16>, vector<128x128xbf16>, vector<8x128xf32> -> vector<8x128xf32>
    %c0_17 = arith.constant 0 : index
    %c0_18 = arith.constant 0 : index
    %22 = vector.load %arg7[%c0_17, %c0_18] : memref<1x128xf32, #tpu.memory_space<vmem>>, vector<1x128xf32>
    %23 = vector.broadcast %22 : vector<1x128xf32> to vector<8x128xf32>
    %24 = arith.addf %21, %23 : vector<8x128xf32>
    %c0_19 = arith.constant 0 : index
    %c0_20 = arith.constant 0 : index
    %25 = vector.load %arg8[%c0_19, %c0_20] : memref<8x128xf32, #tpu.memory_space<vmem>>, vector<8x128xf32>
    tpu.vector_store %arg8[%c0_19, %c0_20], %24 {strides = array<i32>} : memref<8x128xf32, #tpu.memory_space<vmem>>, vector<8x128xf32>,
    return
  }
  func.func @transform_0(%arg0: i32) -> (i32, i32) {
    %c0_i32 = arith.constant 0 : i32
    %c0_i32_0 = arith.constant 0 : i32
    return %arg0, %c0_i32 : i32, i32
  }
  func.func @transform_1(%arg0: i32) -> (i32, i32) {
    %c0_i32 = arith.constant 0 : i32
    %c0_i32_0 = arith.constant 0 : i32
    %c0_i32_1 = arith.constant 0 : i32
    return %c0_i32, %c0_i32_0 : i32, i32
  }
  func.func @transform_2(%arg0: i32) -> (i32, i32) {
    %c0_i32 = arith.constant 0 : i32
    %c0_i32_0 = arith.constant 0 : i32
    %c0_i32_1 = arith.constant 0 : i32
    return %c0_i32, %c0_i32_0 : i32, i32
  }
  func.func @transform_3(%arg0: i32) -> (i32, i32, i32) {
    %c0_i32 = arith.constant 0 : i32
    %c0_i32_0 = arith.constant 0 : i32
    %c0_i32_1 = arith.constant 0 : i32
    %c0_i32_2 = arith.constant 0 : i32
    return %c0_i32, %c0_i32_0, %c0_i32_1 : i32, i32, i32
  }
  func.func @transform_4(%arg0: i32) -> (i32, i32, i32) {
    %c0_i32 = arith.constant 0 : i32
    %c0_i32_0 = arith.constant 0 : i32
    %c0_i32_1 = arith.constant 0 : i32
    %c0_i32_2 = arith.constant 0 : i32
    return %c0_i32, %c0_i32_0, %c0_i32_1 : i32, i32, i32
  }
  func.func @transform_5(%arg0: i32) -> (i32, i32) {
    %c0_i32 = arith.constant 0 : i32
    %c0_i32_0 = arith.constant 0 : i32
    %c0_i32_1 = arith.constant 0 : i32
    return %c0_i32, %c0_i32_0 : i32, i32
  }
  func.func @transform_6(%arg0: i32) -> (i32, i32) {
    %c0_i32 = arith.constant 0 : i32
    %c0_i32_0 = arith.constant 0 : i32
    %c0_i32_1 = arith.constant 0 : i32
    return %c0_i32, %c0_i32_0 : i32, i32
  }
  func.func @transform_7(%arg0: i32) -> (i32, i32) {
    %c0_i32 = arith.constant 0 : i32
    %c0_i32_0 = arith.constant 0 : i32
    return %arg0, %c0_i32 : i32, i32
  }
}

</mosaic_0001>

<bundles_post_ra>
// kernel: tpu_custom_call.1
= control target key start
LH: loop header
LB: loop body
LE: loop exit
PB: predicated region body
PF: predicated region fallthrough
CT: control target
= control target key end

     0   :  { %12 = vsyncpa [#allocation3], 0  ;;  %s1495_s0 = inlined_call_operand.hbm [shape: f32[16,32], index: 0, kind: input, shape index: {}]   ;;  %s1496_s1 = inlined_call_operand.hbm [shape: bf16[32,128], index: 1, kind: input, shape index: {}]   ;;  %s1497_s2 = inlined_call_operand.vmem [shape: f32[1,128], index: 2, kind: input, shape index: {}]   ;;  %s1498_s3 = inlined_call_operand.hbm [shape: bf16[1,128,128], index: 3, kind: input, shape index: {}]   ;;  %s1499_s4 = inlined_call_operand.vmem [shape: f32[1,1,128], index: 4, kind: input, shape index: {}]   ;;  %s1500_s5 = inlined_call_operand.hbm [shape: bf16[128,128], index: 5, kind: input, shape index: {}]   ;;  %s1501_s6 = inlined_call_operand.vmem [shape: f32[1,128], index: 6, kind: input, shape index: {}]   ;;  %s1502_s7 = inlined_call_operand.hbm [shape: f32[16,128], index: 7, kind: output, shape index: {}]  }
   0x1   :  { %14 = vsyncpa [#allocation3 + $0x1], 0 }
   0x2   :  { %15 = vsyncpa [#allocation6], 0 }
   0x3   :  { %16 = vsyncpa [#allocation9], 0 }
   0x4   :  { %17 = vsyncpa [#allocation4], 0 }
   0x5   :  { %19 = vsyncpa [#allocation4 + $0x1], 0  ;;  %s1195_s24 = smov 0   ;;  %s1197_s25 = smov 0  }
   0x6   :  { %s1199_s26 = smov 0   ;;  %s1201_s27 = smov 0  }
   0x7 LB: > { %s1216_s28 = sadd.s32 4294967295, %s1144_s27   ;;  %s748_s29 = sadd.s32 4294967294, %s1144_s27   ;;  %s1144_s27 = sphi %s1201_s27, %s1528_s27   ;;  %s1140_s26 = sphi %s1199_s26, %s1527_s26   ;;  %s1136_s25 = sphi %s1197_s25, %s1526_s25   ;;  %s1132_s24 = sphi %s1195_s24, %s1525_s24  }
   0x8   : > { %p45_p0 = scmp.ne.s32.totalorder %s1136_s25, %s1132_s24  ;;  %p1503_p1 = scmp.eq.s32.totalorder %s1216_s28, 0 }
   0x9   : > { %p201_p3 = scmp.eq.s32.totalorder %s748_s29, 1  ;;  %p749_p5 = scmp.ge.s32.totalorder %s1144_s27, 1 }
   0xa   : > { %p1225_p4 = por %p1503_p1, %p45_p0  ;;  %p208_p7 = scmp.lt.s32.totalorder %s1144_s27, 3 }
   0xb   : > { %p1230_p6 = por %p201_p3, %p45_p0  ;;  %s1146_s10 = smov [#allocation5]  }
   0xc   : > { %s1507_s30 = scalar_select %p1225_p4, 1, 0 }
   0xd   : > { %s1508_s8 = scalar_select %p1230_p6, 1, 0 }
   0xe   : > { %p1235_p8 = pnand %p749_p5, %p208_p7  ;;  %s220_s11 = sshll.u32 %s1146_s10, 4  ;;  %s1239_s11 = int_to_ptr.vmem [resolvable:$true] %s220_s11 }
   0xf   : > { %1509 = sst [smem:[#allocation15_spill]] %s1508_s8  ;;  %s1147_s13 = smov [#allocation7]  }
  0x10   : > { %s1510_s9 = scalar_select %p1235_p8, 1, 0 }
  0x11   : > { %p873_p9 = pneg %p1235_p8  ;;  %s236_s14 = sshll.u32 %s1147_s13, 4  ;;  %s1250_s14 = int_to_ptr.vmem [resolvable:$true] %s236_s14 }
  0x12   : > { %s1148_s15 = smov [#allocation8]   ;;  %s956_s19 = scalar_lea.hbm %s1496_s1, 256 }
  0x13   : > { %p1246_p11 = pnand %p873_p9, %p1503_p1  ;;  %s1252_s16 = sshll.u32 %s1148_s15, 4  ;;  %s253_s16 = int_to_ptr.vmem [resolvable:$true] %s1252_s16 }
  0x14   : > { %p957_p12 = scmp.ne.s32.totalorder %s1496_s1, %s956_s19  ;;  %p963_p5 = scmp.lt.u32.totalorder %s956_s19, %s1496_s1 }
  0x15   : > { %p1262_p13 = pneg %p1246_p11 }
  0x17   : > { %p959_p0 = pnand %p1262_p13, %p957_p12 }
  0x19   : > { %p960_p3 = pneg %p959_p0 }
  0x1b   : > { %p965_p7 = pnand %p963_p5, %p960_p3 }
  0x1d   : > { %968 = shalt.err (!%p965_p7)
}
  0x1e   : > { %s969_s10 = scalar_lea.vmem %s1239_s11, 256  ;;  %p977_p2 = scmp.lt.s32.totalorder %s1239_s11, %s1239_s11 }
  0x1f   : > { %p970_p9 = scmp.ne.s32.totalorder %s1239_s11, %s969_s10  ;;  %p978_p6 = scmp.lt.s32.totalorder %s969_s10, %s969_s10 }
  0x21   : > { %p972_p10 = pnand %p970_p9, %p1262_p13  ;;  %p979_p12 = por %p978_p6, %p977_p2 }
  0x23   : > { %p973_p1 = pneg %p972_p10 }
  0x25   : > { %p980_p0 = pnand %p979_p12, %p973_p1 }
  0x27   : > { %983 = shalt.err (!%p980_p0)
}
  0x28   : > { %s1149_s13 = smov 64   ;;  %s1150_s15 = smov 4  }
  0x29   : > { %876 = dma.hbm_to_vmem [thread:$0]  (!%p1246_p11), %s1496_s1, 256, %s1239_s11, [#allocation6], %s1149_s13, %s1149_s13, %s1150_s15  }
  0x2a   : > { %s984_s21 = scalar_lea.hbm %s1498_s3, 1024 }
  0x2b   : > { %p985_p1 = scmp.ne.s32.totalorder %s1498_s3, %s984_s21  ;;  %p991_p10 = scmp.lt.u32.totalorder %s984_s21, %s1498_s3 }
  0x2d   : > { %p987_p2 = pnand %p985_p1, %p1262_p13 }
  0x2f   : > { %p988_p6 = pneg %p987_p2 }
  0x31   : > { %p993_p3 = pnand %p991_p10, %p988_p6 }
  0x33   : > { %996 = shalt.err (!%p993_p3)
}
  0x34   : > { %s997_s11 = scalar_lea.vmem %s1250_s14, 1024  ;;  %p1005_p12 = scmp.lt.s32.totalorder %s1250_s14, %s1250_s14 }
  0x35   : > { %p998_p5 = scmp.ne.s32.totalorder %s1250_s14, %s997_s11  ;;  %p1006_p0 = scmp.lt.s32.totalorder %s997_s11, %s997_s11 }
  0x37   : > { %p1000_p7 = pnand %p998_p5, %p1262_p13  ;;  %p1007_p1 = por %p1006_p0, %p1005_p12 }
  0x39   : > { %p1001_p9 = pneg %p1000_p7 }
  0x3b   : > { %p1008_p2 = pnand %p1007_p1, %p1001_p9 }
  0x3d   : > { %1011 = shalt.err (!%p1008_p2)
}
  0x3e   : > { %879 = dma.hbm_to_vmem [thread:$0]  (!%p1246_p11), %s1498_s3, 1024, %s1250_s14, [#allocation6], %s1149_s13, %s1149_s13, %s1150_s15  }
  0x3f   : > { %s1012_s20 = scalar_lea.hbm %s1500_s5, 1024 }
  0x40   : > { %p1013_p6 = scmp.ne.s32.totalorder %s1500_s5, %s1012_s20  ;;  %p1019_p5 = scmp.lt.u32.totalorder %s1012_s20, %s1500_s5 }
  0x42   : > { %p1015_p10 = pnand %p1013_p6, %p1262_p13 }
  0x44   : > { %p1016_p3 = pneg %p1015_p10 }
  0x46   : > { %p1021_p7 = pnand %p1019_p5, %p1016_p3 }
  0x48   : > { %1024 = shalt.err (!%p1021_p7)
}
  0x49   : > { %s1025_s11 = scalar_lea.vmem %s253_s16, 1024  ;;  %p1033_p1 = scmp.lt.s32.totalorder %s253_s16, %s253_s16 }
  0x4a   : > { %p1026_p9 = scmp.ne.s32.totalorder %s253_s16, %s1025_s11  ;;  %p1034_p2 = scmp.lt.s32.totalorder %s1025_s11, %s1025_s11 }
  0x4c   : > { %p1028_p12 = pnand %p1026_p9, %p1262_p13  ;;  %p1035_p4 = por %p1034_p2, %p1033_p1 }
  0x4e   : > { %p1029_p0 = pneg %p1028_p12 }
  0x50   : > { %p1036_p8 = pnand %p1035_p4, %p1029_p0 }
  0x52   : > { %1039 = shalt.err (!%p1036_p8)
}
  0x53   : > { %882 = dma.hbm_to_vmem [thread:$0]  (!%p1246_p11), %s1500_s5, 1024, %s253_s16, [#allocation9], %s1149_s13, %s1149_s13, %s1150_s15  }
  0x54   : > { %s1335_s22 = sadd.s32 1, %s1144_s27   ;;  %s32_s17 = sadd.s32 1, %s1140_s26 }
  0x55   : > { %s29_s12 = ssub.s32 %s1144_s27, %s1335_s22  ;;  %p39_p8 = scmp.ne.s32.totalorder %s1140_s26, %s1136_s25 }
  0x56   : > { %p30_p4 = scmp.eq.s32.totalorder %s29_s12, 0  ;;  %p40_p13 = scmp.eq.s32.totalorder %s1144_s27, 0 }
  0x57   : > { %p894_p6 = scmp.lt.s32.totalorder %s1144_s27, 2  ;;  %p1513_p3 = scmp.eq.s32.totalorder %s1216_s28, 1 }
  0x58   : > { %s1345_s18 = scalar_select %p30_p4, %s1140_s26, %s32_s17  }
  0x59   : > { %p41_p10 = por %p40_p13, %p39_p8  ;;  %p1349_p5 = por %p1513_p3, %p39_p8 }
  0x5a   : > { %s269_s20 = sand.u32 1, %s1140_s26   ;;  %s755_s21 = sshll.u32 %s1144_s27, 7 }
  0x5b   : > { %s754_s16 = sshll.u32 %s269_s20, 3  ;;  %s1358_s23 = scalar_lea.hbm %s1495_s0, %s755_s21 }
  0x5c   : > { %s273_s29 = scalar_lea.vmem [#allocation2], %s754_s16  ;;  %p1360_p11 = pnand %p894_p6, %p41_p10 }
  0x5d   : > { %s280_s10 = sshll.u32 %s273_s29, 4  ;;  %s270_s14 = scalar_lea.sflag [#allocation3], %s269_s20  ;;  %s1364_s10 = int_to_ptr.vmem [resolvable:$true] %s280_s10 }
  0x5e   : > { %s1040_s8 = scalar_lea.hbm %s1358_s23, 128  ;;  %p1042_p9 = pneg %p1360_p11 }
  0x5f   : > { %p1041_p7 = scmp.ne.s32.totalorder %s1358_s23, %s1040_s8  ;;  %s1045_s21 = scalar_lea.hbm %s1495_s0, 256 }
  0x60   : > { %p1046_p1 = scmp.lt.u32.totalorder %s1358_s23, %s1495_s0  ;;  %p1047_p2 = scmp.lt.u32.totalorder %s1045_s21, %s1040_s8 }
  0x61   : > { %p1043_p12 = pnand %p1042_p9, %p1041_p7  ;;  %p1049_p8 = scmp.lt.u32.totalorder %s1040_s8, %s1358_s23 }
  0x62   : > { %p1048_p4 = por %p1047_p2, %p1046_p1 }
  0x63   : > { %p1044_p0 = pneg %p1043_p12 }
  0x64   : > { %p1050_p13 = por %p1049_p8, %p1048_p4 }
  0x66   : > { %p1051_p6 = pnand %p1050_p13, %p1044_p0 }
  0x68   : > { %1054 = shalt.err (!%p1051_p6)
}
  0x69   : > { %s1055_s20 = scalar_lea.vmem %s1364_s10, 128  ;;  %s1151_s15 = smov [#allocation2]  }
  0x6a   : > { %p1056_p10 = scmp.ne.s32.totalorder %s1364_s10, %s1055_s20  ;;  %s1060_s29 = sshll.u32 %s1151_s15, 4  ;;  %s1061_s29 = int_to_ptr.vmem [resolvable:$false] %s1060_s29 }
  0x6b   : > { %s1062_s12 = scalar_lea.vmem %s1061_s29, 256  ;;  %p1063_p12 = scmp.lt.s32.totalorder %s1364_s10, %s1061_s29 }
  0x6c   : > { %p1058_p3 = pnand %p1056_p10, %p1042_p9  ;;  %p1064_p1 = scmp.lt.s32.totalorder %s1062_s12, %s1055_s20 }
  0x6e   : > { %p1059_p7 = pneg %p1058_p3  ;;  %p1065_p2 = por %p1064_p1, %p1063_p12 }
  0x70   : > { %p1066_p4 = pnand %p1065_p2, %p1059_p7 }
  0x72   : > { %1069 = shalt.err (!%p1066_p4)
}
  0x73   : > { %886 = dma.hbm_to_vmem [thread:$0]  (!%p1360_p11), %s1358_s23, 128, %s1364_s10, %s270_s14  }
  0x74   : > { %p1516_p0 = scmp.ne.s32.totalorder %s1510_s9, 0 }
  0x75   : > { %s1394_s8 = sand.u32 (!%p1516_p0), 1, %s1136_s25   ;;  %p1517_p9 = scmp.ne.s32.totalorder (!%p1516_p0), %s1507_s30, 0 }
  0x76   : > { %289 = sbr.rel (%p1516_p0) target bundleno = 807 (0x327), region = 48  ;;  %s757_s17 = sshll.u32 (!%p1516_p0), %s1394_s8, 3 }
  0x77   : > { %s292_s21 = scalar_lea.sflag (!%p1516_p0), [#allocation3], %s1394_s8  ;;  %s295_s16 = scalar_lea.vmem (!%p1516_p0), [#allocation2], %s757_s17 }
  0x7d   : > { %1115 = dma.done.wait (%p1517_p9), %s292_s21, 128  }
  0x7e   : > { %1117 = vsyncadd (%p1517_p9), %s292_s21, 4294967168  ;;  %p1518_p11 = scmp.eq.s32.totalorder %s1216_s28, 0 }
  0x80   : > { %1119 = dma.done.wait (%p1518_p11), [#allocation6], 1280   ;;  %p1519_p8 = pmov %p1518_p11 }
  0x82   : > { %1121 = vsyncadd (%p1519_p8), [#allocation6], 4294966016  ;;  %p1520_p13 = pmov %p1519_p8 }
  0x83   : > { %p1521_p6 = pmov %p1519_p8 }
  0x84   : > { %1123 = dma.done.wait (%p1520_p13), [#allocation9], 1024  }
  0x85   : > { %1125 = vsyncadd (%p1521_p6), [#allocation9], 4294966272  ;;  %v1152_v0 = vmov 0.0   ;;  %vm1153_vm0 = vmmov 0   ;;  %v938_v1 = vld [vmem:[#allocation5] sm:$0xff]   ;;  %v939_v2 = vld [vmem:[#allocation5 + $0x8] sm:$0xff]  }
  0x86   : > { %809 = vmatprep.subr.bf16.mxu0 %v1152_v0  ;;  %813 = vmatprep.mubr.msk.bf16.mxu0 %vm1153_vm0, %v1152_v0  ;;  %v339_v3 = vld [vmem:[%s295_s16] sm:$0xff]  ;;  %vm364_vm1 = vcmask 261120   ;;  %v942_v7 = vld [vmem:[#allocation7 + $0x10] sm:$0xff]   ;;  %v943_v8 = vld [vmem:[#allocation7 + $0x18] sm:$0xff]   ;;  %s785_s13 = sshll.u32 %s1216_s28, 7  ;;  %s337_s20 = scalar_lea.vmem [#allocation10], %s757_s17 }
  0x87   : > { %817 = vmatprep.subr.bf16.mxu1 %v1152_v0  ;;  %833 = vmatprep.mubr.msk.bf16.mxu1 %vm1153_vm0, %v1152_v0  ;;  %v940_v4 = vld [vmem:[#allocation7] sm:$0xff]   ;;  %v340_v5 = vpack.c.bf16 %v339_v3, %v339_v3  ;;  %v941_v6 = vld [vmem:[#allocation7 + $0x8] sm:$0xff]   ;;  %v946_v11 = vld [vmem:[#allocation7 + $0x30] sm:$0xff]   ;;  %s649_s15 = sshll.u32 %s337_s20, 4  ;;  %s1451_s21 = scalar_lea.hbm %s1502_s7, %s785_s13  ;;  %s1453_s15 = int_to_ptr.vmem [resolvable:$true] %s649_s15 }
  0x88   : > { %810 = vmatpush3.bf16.msra.mxu0 %v938_v1  ;;  %818 = vmatpush3.bf16.msra.mxu1 %v940_v4  ;;  %v944_v9 = vld [vmem:[#allocation7 + $0x20] sm:$0xff]   ;;  %v945_v10 = vld [vmem:[#allocation7 + $0x28] sm:$0xff]   ;;  %v947_v12 = vld [vmem:[#allocation7 + $0x38] sm:$0xff]   ;;  %s636_s28 = scalar_lea.sflag [#allocation4], %s1394_s8  ;;  %s1070_s16 = scalar_lea.vmem %s1453_s15, 128 }
  0x89   : > { %811 = vmatprep.subr.bf16.mxu0 %v1152_v0  ;;  %819 = vmatprep.subr.bf16.mxu1 %v1152_v0  ;;  %v948_v13 = vld [vmem:[#allocation8] sm:$0xff]   ;;  %v949_v14 = vld [vmem:[#allocation8 + $0x8] sm:$0xff]   ;;  %v950_v15 = vld [vmem:[#allocation8 + $0x10] sm:$0xff]   ;;  %p1071_p10 = scmp.ne.s32.totalorder %s1453_s15, %s1070_s16  ;;  %s1154_s17 = smov [#allocation10]  }
  0x8a   : > { %v951_v16 = vld [vmem:[#allocation8 + $0x18] sm:$0xff]   ;;  %v952_v17 = vld [vmem:[#allocation8 + $0x20] sm:$0xff]   ;;  %v953_v18 = vld [vmem:[#allocation8 + $0x28] sm:$0xff]   ;;  %s1074_s30 = sshll.u32 %s1154_s17, 4  ;;  %s1075_s30 = int_to_ptr.vmem [resolvable:$false] %s1074_s30 }
  0x8b   : > { %v762_v19 = vld [vmem:[%s1497_s2] ss:$0 sm:$0xff]  ;;  %v954_v27 = vld [vmem:[#allocation8 + $0x30] sm:$0xff]   ;;  %v955_v28 = vld [vmem:[#allocation8 + $0x38] sm:$0xff]   ;;  %p1072_p3 = pnand %p1071_p10, %p1349_p5  ;;  %s1076_s9 = scalar_lea.vmem %s1075_s30, 256 }
  0x8c   : > { %812 = vmatpush3.bf16.msra.mxu0 %v939_v2  ;;  %820 = vmatpush3.bf16.msra.mxu1 %v941_v6  ;;  %v766_v29 = vld [vmem:[%s1499_s4] ss:$0 sm:$0xff]  ;;  %p1077_p12 = scmp.lt.s32.totalorder %s1453_s15, %s1075_s30  ;;  %p1078_p1 = scmp.lt.s32.totalorder %s1076_s9, %s1070_s16 }
  0x8d   : > { %837 = vmatprep.subr.bf16.mxu0 %v1152_v0  ;;  %821 = vmatprep.subr.bf16.mxu1 %v1152_v0  ;;  %v775_v37 = vld [vmem:[%s1501_s6] ss:$0 sm:$0xff]  ;;  %p1073_p7 = pneg %p1072_p3 }
  0x8e   : > { %p1079_p2 = por %p1078_p1, %p1077_p12 }
  0x8f   : > { %814 = vmatmul.mubr.msk.bf16.vlgmr.msra.gmra.mrb[0].mxu0 %vm364_vm1, %v340_v5 }
  0x90   : > { %853 = vmatprep.mubr.msk.bf16.mxu0 %vm1153_vm0, %v1152_v0  ;;  %822 = vmatpush3.bf16.msra.mxu1 %v942_v7  ;;  %p1080_p4 = pnand %p1079_p2, %p1073_p7 }
  0x91   : > { %823 = vmatprep.subr.bf16.mxu1 %v1152_v0  ;;  %838 = vmatpush3.bf16.msra.mxu0 %v948_v13 }
  0x92   : > { %839 = vmatprep.subr.bf16.mxu0 %v1152_v0 }
  0x94   : > { %824 = vmatpush3.bf16.msra.mxu1 %v943_v8 }
  0x95   : > { %825 = vmatprep.subr.bf16.mxu1 %v1152_v0  ;;  %840 = vmatpush3.bf16.msra.mxu0 %v949_v14 }
  0x96   : > { %841 = vmatprep.subr.bf16.mxu0 %v1152_v0 }
  0x98   : > { %826 = vmatpush3.bf16.msra.mxu1 %v944_v9 }
  0x99   : > { %827 = vmatprep.subr.bf16.mxu1 %v1152_v0  ;;  %842 = vmatpush3.bf16.msra.mxu0 %v950_v15 }
  0x9a   : > { %843 = vmatprep.subr.bf16.mxu0 %v1152_v0 }
  0x9c   : > { %828 = vmatpush3.bf16.msra.mxu1 %v945_v10 }
  0x9d   : > { %829 = vmatprep.subr.bf16.mxu1 %v1152_v0  ;;  %844 = vmatpush3.bf16.msra.mxu0 %v951_v16 }
  0x9e   : > { %845 = vmatprep.subr.bf16.mxu0 %v1152_v0 }
  0xa0   : > { %830 = vmatpush3.bf16.msra.mxu1 %v946_v11 }
  0xa1   : > { %831 = vmatprep.subr.bf16.mxu1 %v1152_v0  ;;  %846 = vmatpush3.bf16.msra.mxu0 %v952_v17 }
  0xa2   : > { %847 = vmatprep.subr.bf16.mxu0 %v1152_v0 }
  0xa4   : > { %832 = vmatpush3.bf16.msra.mxu1 %v947_v12 }
  0xa5   : > { %848 = vmatpush3.bf16.msra.mxu0 %v953_v18 }
  0xa6   : > { %849 = vmatprep.subr.bf16.mxu0 %v1152_v0 }
  0xa9   : > { %850 = vmatpush3.bf16.msra.mxu0 %v954_v27 }
  0xaa   : > { %851 = vmatprep.subr.bf16.mxu0 %v1152_v0 }
  0xad   : > { %852 = vmatpush3.bf16.msra.mxu0 %v955_v28 }
 0x162   : > { %v402_v20 = vpop.f32.mrb[0].mxu0 }
 0x163   : > { %v403_v21 = vadd.f32 %v762_v19, %v402_v20  ;;  %v815_v22 = vpop.f32.mrb[1].mxu0 }
 0x164   : > { %v405_v23 = vpop.f32.mrb[2].mxu0 }
 0x165   : > { %v408_v24 = vmax.f32 %v403_v21, 0.0  ;;  %v816_v25 = vpop.f32.mrb[3].mxu0 }
 0x167   : > { %v409_v26 = vpack.c.bf16 %v408_v24, %v408_v24 }
 0x169   : > { %834 = vmatmul.mubr.bf16.vlgmr.msra.gmra.mrb[0].mxu1 %v409_v26 }
 0x23c   : > { %v515_v30 = vpop.f32.mrb[0].mxu1 }
 0x23d   : > { %v516_v31 = vadd.f32 %v766_v29, %v515_v30  ;;  %v835_v32 = vpop.f32.mrb[1].mxu1 }
 0x23e   : > { %v518_v33 = vpop.f32.mrb[2].mxu1 }
 0x23f   : > { %v521_v34 = vmax.f32 %v516_v31, 0.0  ;;  %v836_v35 = vpop.f32.mrb[3].mxu1 }
 0x241   : > { %v522_v36 = vpack.c.bf16 %v521_v34, %v521_v34 }
 0x243   : > { %854 = vmatmul.mubr.bf16.vlgmr.msra.gmra.mrb[4].mxu0 %v522_v36 }
 0x316   : > { %v628_v38 = vpop.f32.mrb[4].mxu0 }
 0x317   : > { %v629_v39 = vadd.f32 %v775_v37, %v628_v38  ;;  %v855_v40 = vpop.f32.mrb[5].mxu0 }
 0x318   : > { %v631_v41 = vpop.f32.mrb[6].mxu0 }
 0x319   : > { %634 = vst [vmem:[%s337_s20] sm:$0xff] %v629_v39  ;;  %v856_v42 = vpop.f32.mrb[7].mxu0 }
 0x31a   : > { %1083 = shalt.err (!%p1080_p4)
}
 0x31b   : > { %s1084_s8 = scalar_lea.hbm %s1451_s21, 128  ;;  %s1088_s11 = scalar_lea.hbm %s1502_s7, 256 }
 0x31c   : > { %p1085_p0 = scmp.ne.s32.totalorder %s1451_s21, %s1084_s8  ;;  %p1089_p8 = scmp.lt.u32.totalorder %s1451_s21, %s1502_s7 }
 0x31d   : > { %p1090_p13 = scmp.lt.u32.totalorder %s1088_s11, %s1084_s8  ;;  %p1092_p10 = scmp.lt.u32.totalorder %s1084_s8, %s1451_s21 }
 0x31e   : > { %p1086_p9 = pnand %p1085_p0, %p1349_p5 }
 0x31f   : > { %p1091_p6 = por %p1090_p13, %p1089_p8 }
 0x320   : > { %p1087_p11 = pneg %p1086_p9 }
 0x321   : > { %p1093_p3 = por %p1092_p10, %p1091_p6 }
 0x323   : > { %p1094_p7 = pnand %p1093_p3, %p1087_p11 }
 0x325   : > { %1097 = shalt.err (!%p1094_p7)
}
 0x326   : > { %871 = dma.vmem_to_hbm [thread:$0]  (%p1349_p5), %s1453_s15, 128, %s1451_s21, %s636_s28  }
 0x327 PF: > { %s1522_s20 = sld [smem:[#allocation15_spill]]  ;;  %s661_s29 = sand.u32 1, %s1132_s24  }
 0x328   : > { %p1524_p1 = scmp.ge.s32.totalorder %s1144_s27, 2  ;;  %s662_s12 = scalar_lea.sflag [#allocation4], %s661_s29 }
 0x32d   : > { %p1523_p12 = scmp.ne.s32.totalorder %s1522_s20, 0 }
 0x32f   : > { %p888_p2 = pnand %p1524_p1, %p1523_p12 }
 0x331   : > { %1127 = dma.done.wait (!%p888_p2), %s662_s12, 128  }
 0x332   : > { %1129 = vsyncadd (!%p888_p2), %s662_s12, 4294967168  ;;  %p22_p4 = scmp.ge.s32.totalorder %s1335_s22, 4   ;;  %s1525_s24 = smov %s1136_s25 }
 0x333   : > { %s1526_s25 = smov %s1140_s26  ;;  %s1527_s26 = smov %s1345_s18 }
 0x334   : > { %s1528_s27 = smov %s1335_s22  ;;  %24 = sbr.rel (!%p22_p4) target bundleno = 7 (0x7), region = 105 }
 0x33b   :  { %667 = vsyncpa [#allocation3], 1 }
 0x33c   :  { %669 = vsyncpa [#allocation3 + $0x1], 1 }
 0x33d   :  { %670 = vsyncpa [#allocation6], 1 }
 0x33e   :  { %671 = vsyncpa [#allocation9], 1 }
 0x33f   :  { %672 = vsyncpa [#allocation4], 1 }
 0x340   :  { %674 = vsyncpa [#allocation4 + $0x1], 1 }

</bundles_post_ra>
